<compile_context>
chip_gen: v7x
topology: tpu7x:2x2x1
jax: 0.10.0
libtpu: 0.0.40
codegen_flags: <defaults>
</compile_context>

<pallas_src>
import functools
import math

import jax
import jax.numpy as jnp
from jax.experimental import pallas as pl
from jax.experimental.pallas import tpu as pltpu

IMG_HEIGHT = 28
IMG_WIDTH = 28
IMG_PIXELS = IMG_HEIGHT * IMG_WIDTH  # 784

_LANE = 128
_SUBLANE = 8


def _round_up(x, m):
    return ((x + m - 1) // m) * m


def _select_tiling():
    """Per-generation (block_b, vmem_limit_bytes). Conservative fallback if the
    hardware query is unavailable (works on every generation)."""
    try:
        vmem_cap = pltpu.get_tpu_info().vmem_capacity_bytes
    except Exception:  # pragma: no cover - query not available / non-TPU tracing
        vmem_cap = 64 << 20
    if vmem_cap >= (96 << 20):      # v5e / v6e: 128 MiB VMEM per TensorCore
        return 1024, 32 << 20
    return 512, 24 << 20            # v7x: 64 MiB VMEM per TensorCore (32 MiB scoped)


def _pick_tm(B, block_b):
    """Batch tile: multiple of 8, <= block_b, chosen so padded-row waste < TM/2
    (the kernel is write-bound, padded rows are wasted HBM bandwidth)."""
    block_b = max(_round_up(block_b, _SUBLANE), _SUBLANE)
    B8 = _round_up(max(B, 1), _SUBLANE)
    if B8 <= block_b:
        return B8                   # single tile, at most 7 padded rows
    tm = block_b
    while tm >= 64:
        waste = _round_up(B, tm) - B
        if 2 * waste < tm:
            return tm
        tm //= 2
    return 64


def decoder_kernel(z_ref, w1_ref, b1_ref, w2_ref, b2_ref, out_ref, *, matmul_dtype):
    """Fused 2-layer MLP on one batch tile: relu(z @ W1 + b1) @ W2 + b2.

    Weights arrive already in `matmul_dtype` (pre-cast once in the wrapper); only the
    tiny z tile and the intermediate h need an in-kernel cast. All accumulation and
    elementwise math is f32 (v5e-safe)."""
    z = z_ref[...].astype(matmul_dtype)                            # (TM, z_dim) - tiny
    h = jnp.dot(z, w1_ref[...], preferred_element_type=jnp.float32)  # MXU, f32 acc
    h = jnp.maximum(h + b1_ref[...], 0.0)                          # f32 VPU
    o = jnp.dot(h.astype(matmul_dtype), w2_ref[...],
                preferred_element_type=jnp.float32)                # MXU, f32 acc
    out_ref[...] = (o + b2_ref[...]).astype(out_ref.dtype)         # single HBM write


def decoder_forward(z, w1, b1, w2, b2, *, block_b=None, matmul_dtype=jnp.bfloat16,
                    out_dtype=jnp.float32):
    """Pallas forward pass of the Decoder.

    z:  (B, z_dim) f32
    w1: (z_dim, hidden), b1: (hidden,) or (1, hidden)
    w2: (hidden, 784),   b2: (784,)   or (1, 784)
    Returns (B, 784) in `out_dtype`.
    """
    B, z_dim = z.shape
    hidden = w1.shape[1]
    assert w1.shape == (z_dim, hidden)
    assert w2.shape == (hidden, IMG_PIXELS)

    if B == 0:
        return jnp.zeros((0, IMG_PIXELS), out_dtype)

    auto_block_b, vmem_limit = _select_tiling()
    if block_b is None:
        block_b = auto_block_b

    Hp = _round_up(hidden, _LANE)   # 500 -> 512 (lane-dense hidden, exact zero padding)
    Op = IMG_PIXELS                 # 784 kept at true width (full-last-dim block)

    # Zero-pad the hidden dimension and pre-cast weights to the matmul dtype ONCE here,
    # so the kernel does no per-step weight casts. Biases stay f32 (added to f32 acc).
    w1p = jnp.pad(w1, ((0, 0), (0, Hp - hidden))).astype(matmul_dtype)
    b1p = jnp.pad(b1.reshape(1, hidden).astype(jnp.float32), ((0, 0), (0, Hp - hidden)))
    w2p = jnp.pad(w2, ((0, Hp - hidden), (0, 0))).astype(matmul_dtype)
    b2p = b2.reshape(1, Op).astype(jnp.float32)

    # Batch tiling (multiple of 8 rows, waste-aware).
    TM = _pick_tm(B, block_b)
    Bp = _round_up(B, TM)
    zp = jnp.pad(z, ((0, Bp - B), (0, 0))) if Bp != B else z
    grid = (Bp // TM,)
    # TODO(synk): for tiny batches on v7x (grid == (1,)) a second parallel grid axis over
    # output columns would engage both TensorCores; omitted to keep a single lane-dense
    # 784-wide output block.

    kernel = functools.partial(decoder_kernel, matmul_dtype=matmul_dtype)

    wbytes = jnp.dtype(matmul_dtype).itemsize
    obytes = jnp.dtype(out_dtype).itemsize
    cost = pl.CostEstimate(
        flops=2 * Bp * (z_dim * Hp + Hp * Op),
        transcendentals=0,
        bytes_accessed=(Bp * z_dim * 4 + z_dim * Hp * wbytes + Hp * 4
                        + Hp * Op * wbytes + Op * 4 + Bp * Op * obytes),
    )

    out = pl.pallas_call(
        kernel,
        out_shape=jax.ShapeDtypeStruct((Bp, Op), out_dtype),
        grid=grid,
        in_specs=[
            pl.BlockSpec((TM, z_dim), lambda i: (i, 0)),   # batch-tiled activations
            pl.BlockSpec((z_dim, Hp), lambda i: (0, 0)),   # resident weights / biases
            pl.BlockSpec((1, Hp), lambda i: (0, 0)),
            pl.BlockSpec((Hp, Op), lambda i: (0, 0)),
            pl.BlockSpec((1, Op), lambda i: (0, 0)),
        ],
        out_specs=pl.BlockSpec((TM, Op), lambda i: (i, 0)),
        compiler_params=pltpu.CompilerParams(
            dimension_semantics=("parallel",),
            vmem_limit_bytes=vmem_limit,
        ),
        cost_estimate=cost,
    )(zp, w1p, b1p, w2p, b2p)

    return out if Bp == B else out[:B]


def init_decoder_params(key, z_dim=20, hidden_dim=500):
    """Deterministic init mirroring PyTorch nn.Linear defaults:
    U(-1/sqrt(fan_in), 1/sqrt(fan_in)) for both weight and bias."""
    k1, k2, k3, k4 = jax.random.split(key, 4)
    bound1 = 1.0 / math.sqrt(z_dim)
    bound2 = 1.0 / math.sqrt(hidden_dim)
    w1 = jax.random.uniform(k1, (z_dim, hidden_dim), jnp.float32, -bound1, bound1)
    b1 = jax.random.uniform(k2, (1, hidden_dim), jnp.float32, -bound1, bound1)
    w2 = jax.random.uniform(k3, (hidden_dim, IMG_PIXELS), jnp.float32, -bound2, bound2)
    b2 = jax.random.uniform(k4, (1, IMG_PIXELS), jnp.float32, -bound2, bound2)
    return w1, b1, w2, b2


def decoder_reference(z, w1, b1, w2, b2):
    """Pure-JAX reference (same semantics as the PyTorch module)."""
    h = jnp.maximum(z @ w1 + b1, 0.0)
    return h @ w2 + b2


if __name__ == "__main__":
    key = jax.random.PRNGKey(0)
    kz, kp = jax.random.split(key)

    batch, z_dim, hidden_dim = 8, 20, 500
    z = jax.random.normal(kz, (batch, z_dim), jnp.float32)
    w1, b1, w2, b2 = init_decoder_params(kp, z_dim=z_dim, hidden_dim=hidden_dim)

    ref = decoder_reference(z, w1, b1, w2, b2)

    # Default path: bf16 matmul operands (pre-cast weights, f32 accumulation), f32 out.
    mean = jax.block_until_ready(decoder_forward(z, w1, b1, w2, b2))
    assert mean.shape == (batch, IMG_PIXELS), mean.shape
    assert mean.dtype == jnp.float32
    assert jnp.allclose(mean, ref, atol=5e-2, rtol=5e-2), "bf16-matmul mismatch vs reference"

    # f32-operand path: tight tolerance vs the pure-JAX reference.
    mean_f32 = jax.block_until_ready(
        decoder_forward(z, w1, b1, w2, b2, matmul_dtype=jnp.float32))
    assert mean_f32.shape == (batch, IMG_PIXELS), mean_f32.shape
    assert jnp.allclose(mean_f32, ref, atol=1e-4, rtol=1e-4), "f32 mismatch vs reference"

    # bf16 output path (halves the dominant HBM write stream): looser tolerance.
    mean_bf16o = jax.block_until_ready(
        decoder_forward(z, w1, b1, w2, b2, out_dtype=jnp.bfloat16))
    assert mean_bf16o.shape == (batch, IMG_PIXELS), mean_bf16o.shape
    assert mean_bf16o.dtype == jnp.bfloat16
    assert jnp.allclose(mean_bf16o.astype(jnp.float32), ref, atol=5e-2, rtol=5e-2), \
        "bf16-output mismatch vs reference"

    print("KERNEL_OK")
</pallas_src>

<mosaic_0001>
module attributes {stable_mosaic.version = 11 : i64} {
  func.func @decoder_kernel(%arg0: i32, %arg1: memref<8x20xf32, #tpu.memory_space<vmem>>, %arg2: memref<20x512xbf16, #tpu.memory_space<vmem>>, %arg3: memref<1x512xf32, #tpu.memory_space<vmem>>, %arg4: memref<512x784xbf16, #tpu.memory_space<vmem>>, %arg5: memref<1x784xf32, #tpu.memory_space<vmem>>, %arg6: memref<8x784xf32, #tpu.memory_space<vmem>>) attributes {dimension_semantics = [#tpu.dimension_semantics<parallel>], iteration_bounds = array<i64: 1>, scalar_prefetch = 0 : i64, scratch_operands = 0 : i64, tpu.core_type = #tpu.core_type<tc>, window_params = [{transform_indices = @transform_0, window_bounds = array<i64: 8, 20>}, {pipeline_mode = #tpu.pipeline_mode<synchronous>, transform_indices = @transform_1, window_bounds = array<i64: 20, 512>}, {pipeline_mode = #tpu.pipeline_mode<synchronous>, transform_indices = @transform_2, window_bounds = array<i64: 1, 512>}, {pipeline_mode = #tpu.pipeline_mode<synchronous>, transform_indices = @transform_3, window_bounds = array<i64: 512, 784>}, {pipeline_mode = #tpu.pipeline_mode<synchronous>, transform_indices = @transform_4, window_bounds = array<i64: 1, 784>}, {transform_indices = @transform_5, window_bounds = array<i64: 8, 784>}]} {
    %c0 = arith.constant 0 : index
    %c0_0 = arith.constant 0 : index
    %0 = vector.load %arg1[%c0, %c0_0] : memref<8x20xf32, #tpu.memory_space<vmem>>, vector<8x20xf32>
    %1 = arith.truncf %0 : vector<8x20xf32> to vector<8x20xbf16>
    %c0_1 = arith.constant 0 : index
    %c0_2 = arith.constant 0 : index
    %2 = vector.load %arg2[%c0_1, %c0_2] : memref<20x512xbf16, #tpu.memory_space<vmem>>, vector<20x512xbf16>
    %cst = arith.constant dense<0.000000e+00> : vector<8x512xf32>
    %3 = tpu.matmul %1, %2, %cst {dimension_numbers = #tpu.dot_dimension_numbers<[1], [0], [0], [1], [0, 0, 1, 1], [], []>} : vector<8x20xbf16>, vector<20x512xbf16>, vector<8x512xf32> -> vector<8x512xf32>
    %c0_3 = arith.constant 0 : index
    %c0_4 = arith.constant 0 : index
    %4 = vector.load %arg3[%c0_3, %c0_4] : memref<1x512xf32, #tpu.memory_space<vmem>>, vector<1x512xf32>
    %5 = vector.broadcast %4 : vector<1x512xf32> to vector<8x512xf32>
    %6 = arith.addf %3, %5 : vector<8x512xf32>
    %cst_5 = arith.constant 0.000000e+00 : f32
    %7 = vector.broadcast %cst_5 : f32 to vector<8x512xf32>
    %8 = arith.maximumf %6, %7 : vector<8x512xf32>
    %9 = arith.truncf %8 : vector<8x512xf32> to vector<8x512xbf16>
    %c0_6 = arith.constant 0 : index
    %c0_7 = arith.constant 0 : index
    %10 = vector.load %arg4[%c0_6, %c0_7] : memref<512x784xbf16, #tpu.memory_space<vmem>>, vector<512x784xbf16>
    %cst_8 = arith.constant dense<0.000000e+00> : vector<8x784xf32>
    %11 = tpu.matmul %9, %10, %cst_8 {dimension_numbers = #tpu.dot_dimension_numbers<[1], [0], [0], [1], [0, 0, 1, 1], [], []>} : vector<8x512xbf16>, vector<512x784xbf16>, vector<8x784xf32> -> vector<8x784xf32>
    %c0_9 = arith.constant 0 : index
    %c0_10 = arith.constant 0 : index
    %12 = vector.load %arg5[%c0_9, %c0_10] : memref<1x784xf32, #tpu.memory_space<vmem>>, vector<1x784xf32>
    %13 = vector.broadcast %12 : vector<1x784xf32> to vector<8x784xf32>
    %14 = arith.addf %11, %13 : vector<8x784xf32>
    %c0_11 = arith.constant 0 : index
    %c0_12 = arith.constant 0 : index
    %15 = vector.load %arg6[%c0_11, %c0_12] : memref<8x784xf32, #tpu.memory_space<vmem>>, vector<8x784xf32>
    tpu.vector_store %arg6[%c0_11, %c0_12], %14 {strides = array<i32>} : memref<8x784xf32, #tpu.memory_space<vmem>>, vector<8x784xf32>,
    return
  }
  func.func @transform_0(%arg0: i32) -> (i32, i32) {
    %c0_i32 = arith.constant 0 : i32
    %c0_i32_0 = arith.constant 0 : i32
    return %arg0, %c0_i32 : i32, i32
  }
  func.func @transform_1(%arg0: i32) -> (i32, i32) {
    %c0_i32 = arith.constant 0 : i32
    %c0_i32_0 = arith.constant 0 : i32
    %c0_i32_1 = arith.constant 0 : i32
    return %c0_i32, %c0_i32_0 : i32, i32
  }
  func.func @transform_2(%arg0: i32) -> (i32, i32) {
    %c0_i32 = arith.constant 0 : i32
    %c0_i32_0 = arith.constant 0 : i32
    %c0_i32_1 = arith.constant 0 : i32
    return %c0_i32, %c0_i32_0 : i32, i32
  }
  func.func @transform_3(%arg0: i32) -> (i32, i32) {
    %c0_i32 = arith.constant 0 : i32
    %c0_i32_0 = arith.constant 0 : i32
    %c0_i32_1 = arith.constant 0 : i32
    return %c0_i32, %c0_i32_0 : i32, i32
  }
  func.func @transform_4(%arg0: i32) -> (i32, i32) {
    %c0_i32 = arith.constant 0 : i32
    %c0_i32_0 = arith.constant 0 : i32
    %c0_i32_1 = arith.constant 0 : i32
    return %c0_i32, %c0_i32_0 : i32, i32
  }
  func.func @transform_5(%arg0: i32) -> (i32, i32) {
    %c0_i32 = arith.constant 0 : i32
    %c0_i32_0 = arith.constant 0 : i32
    return %arg0, %c0_i32 : i32, i32
  }
}

</mosaic_0001>

<bundles_post_ra>
// kernel: tpu_custom_call.1
= control target key start
LH: loop header
LB: loop body
LE: loop exit
PB: predicated region body
PF: predicated region fallthrough
CT: control target
= control target key end

     0   :  { %vm86_vm0 = vcmask 1041408   ;;  %v2636_v3 = vmov 0   ;;  %vm82_vm1 = vcmask 162816   ;;  %s3443_s0 = inlined_call_operand.vmem [shape: f32[8,20], index: 0, kind: input, shape index: {}]   ;;  %s3444_s1 = inlined_call_operand.vmem [shape: bf16[20,512], index: 1, kind: input, shape index: {}]   ;;  %s3445_s2 = inlined_call_operand.vmem [shape: f32[1,512], index: 2, kind: input, shape index: {}]   ;;  %s3446_s3 = inlined_call_operand.vmem [shape: bf16[512,784], index: 3, kind: input, shape index: {}]   ;;  %s3447_s4 = inlined_call_operand.vmem [shape: f32[1,784], index: 4, kind: input, shape index: {}]   ;;  %s3448_s5 = inlined_call_operand.hbm [shape: f32[8,784], index: 5, kind: output, shape index: {}]  }
   0x1   :  { %v2282_v0 = vld [vmem:[%s3444_s1 + $0x4] ss:$16 sps:$4 sm:$0xff]   ;;  %v2284_v1 = vld [vmem:[%s3444_s1] ss:$16 sps:$4 sm:$0xff]   ;;  %131 = vmatprep.mubr.bf16.mxu1 %v2636_v3  ;;  %v2289_v7 = vld [vmem:[%s3444_s1 + $0xc] ss:$16 sps:$4 sm:$0xff]  }
   0x2   :  { %v28_v2 = vld [vmem:[%s3444_s1 + $0x20] sm:$0x33]  ;;  %99 = vmatprep.subr.bf16.mxu1 %v2282_v0  ;;  %v2287_v10 = vld [vmem:[%s3444_s1 + $0x8] ss:$16 sps:$4 sm:$0xff]   ;;  %v2304_v18 = vld [vmem:[%s3446_s3 + $0x74] ss:$28 sps:$4 sm:$0xff]  }
   0x3   :  { %v1987_v4 = vcombine.high %v28_v2, %v28_v2  ;;  %v1986_v5 = vcombine.low %v28_v2, %v28_v2  ;;  %100 = vmatpush1.bf16.msra.mxu1 %v2284_v1  ;;  %v22_v6 = vld [vmem:[%s3443_s0] sm:$0xff]  ;;  %v29_v11 = vld [vmem:[%s3444_s1 + $0x28] sm:$0x33]  ;;  %v2298_v14 = vld [vmem:[%s3446_s3 + $0x3c] ss:$28 sps:$4 sm:$0xff]  }
   0x4   :  { %v2292_v9 = vld [vmem:[%s3446_s3 + $0x4] ss:$28 sps:$4 sm:$0xff]   ;;  %v23_v12 = vpack.c.bf16 %v22_v6, %v22_v6  ;;  %v1989_v15 = vcombine.high %v29_v11, %v29_v11  ;;  %v1988_v16 = vcombine.low %v29_v11, %v29_v11  ;;  %v2303_v17 = vld [vmem:[%s3446_s3 + $0x38] ss:$28 sps:$4 sm:$0xff]   ;;  %v2296_v19 = vld [vmem:[%s3446_s3 + $0xc] ss:$28 sps:$4 sm:$0xff]  }
   0x5   :  { %1990 = vmatprep.subr.msk.bf16.mxu1 %vm86_vm0, %v1987_v4  ;;  %v88_v8 = vsel %vm86_vm0, %v1986_v5, 0  ;;  %1634 = vmatprep.subr.bf16.mxu0 %v2292_v9  ;;  %v2297_v13 = vld [vmem:[%s3446_s3] ss:$28 sps:$4 sm:$0xff]   ;;  %v2309_v21 = vld [vmem:[%s3446_s3 + $0x70] ss:$28 sps:$4 sm:$0xff]  }
   0x6   :  { %1635 = vmatpush1.bf16.msra.mxu0 %v2297_v13  ;;  %v94_v20 = vsel %vm86_vm0, %v1988_v16, 0  ;;  %v2310_v22 = vld [vmem:[%s3446_s3 + $0xac] ss:$28 sps:$4 sm:$0xff]   ;;  %v2302_v24 = vld [vmem:[%s3446_s3 + $0x44] ss:$28 sps:$4 sm:$0xff]  }
   0x7   :  { %102 = vmatpush1.bf16.msra.mxu1 %v88_v8  ;;  %1636 = vmatprep.subr.bf16.mxu0 %v2298_v14  ;;  %v2294_v23 = vld [vmem:[%s3446_s3 + $0x8] ss:$28 sps:$4 sm:$0xff]   ;;  %v2300_v27 = vld [vmem:[%s3446_s3 + $0x40] ss:$28 sps:$4 sm:$0xff]   ;;  %v2306_v31 = vld [vmem:[%s3446_s3 + $0x78] ss:$28 sps:$4 sm:$0xff]  }
   0x8   :  { %140 = vmatprep.subr.bf16.mxu1 %v2289_v7  ;;  %v2315_v25 = vld [vmem:[%s3446_s3 + $0xa8] ss:$28 sps:$4 sm:$0xff]   ;;  %v2308_v28 = vld [vmem:[%s3446_s3 + $0x7c] ss:$28 sps:$4 sm:$0xff]   ;;  %v2314_v32 = vld [vmem:[%s3446_s3 + $0xb4] ss:$28 sps:$4 sm:$0xff]  }
   0x9   :  { %v2316_v26 = vld [vmem:[%s3446_s3 + $0xe4] ss:$28 sps:$4 sm:$0xff]   ;;  %v2322_v30 = vld [vmem:[%s3446_s3 + $0x11c] ss:$28 sps:$4 sm:$0xff]   ;;  %v2328_v34 = vld [vmem:[%s3446_s3 + $0x154] ss:$28 sps:$4 sm:$0xff]  }
   0xa   :  { %1991 = vmatmul.mubr.msk.bf16.vlgmr.msra.gmra.mrb[0].mxu1 %vm82_vm1, %v23_v12  ;;  %1637 = vmatpush1.bf16.msra.mxu0 %v2303_v17  ;;  %v2321_v29 = vld [vmem:[%s3446_s3 + $0xe0] ss:$28 sps:$4 sm:$0xff]   ;;  %v2327_v33 = vld [vmem:[%s3446_s3 + $0x118] ss:$28 sps:$4 sm:$0xff]   ;;  %v2312_v35 = vld [vmem:[%s3446_s3 + $0xb0] ss:$28 sps:$4 sm:$0xff]  }
   0xb   :  { %141 = vmatpush1.bf16.msra.mxu1 %v2287_v10  ;;  %172 = vmatprep.mubr.bf16.mxu1 %v2636_v3  ;;  %v2320_v36 = vld [vmem:[%s3446_s3 + $0xec] ss:$28 sps:$4 sm:$0xff]   ;;  %v2326_v40 = vld [vmem:[%s3446_s3 + $0x124] ss:$28 sps:$4 sm:$0xff]   ;;  %v2332_v44 = vld [vmem:[%s3446_s3 + $0x15c] ss:$28 sps:$4 sm:$0xff]  }
   0xc   :  { %1992 = vmatprep.subr.msk.bf16.mxu1 %vm86_vm0, %v1989_v15  ;;  %1638 = vmatprep.subr.bf16.mxu0 %v2304_v18  ;;  %v2333_v37 = vld [vmem:[%s3446_s3 + $0x150] ss:$28 sps:$4 sm:$0xff]   ;;  %v2318_v39 = vld [vmem:[%s3446_s3 + $0xe8] ss:$28 sps:$4 sm:$0xff]   ;;  %v2324_v43 = vld [vmem:[%s3446_s3 + $0x120] ss:$28 sps:$4 sm:$0xff]  }
   0xd   :  { %v2334_v38 = vld [vmem:[%s3446_s3 + $0x18c] ss:$28 sps:$4 sm:$0xff]   ;;  %v2340_v42 = vld [vmem:[%s3446_s3 + $0x1c4] ss:$28 sps:$4 sm:$0xff]   ;;  %v2346_v46 = vld [vmem:[%s3446_s3 + $0x1fc] ss:$28 sps:$4 sm:$0xff]  }
   0xe   :  { %1639 = vmatpush1.bf16.msra.mxu0 %v2309_v21  ;;  %v2339_v41 = vld [vmem:[%s3446_s3 + $0x188] ss:$28 sps:$4 sm:$0xff]   ;;  %v2345_v45 = vld [vmem:[%s3446_s3 + $0x1c0] ss:$28 sps:$4 sm:$0xff]   ;;  %v2330_v47 = vld [vmem:[%s3446_s3 + $0x158] ss:$28 sps:$4 sm:$0xff]  }
   0xf   :  { %143 = vmatpush1.bf16.msra.mxu1 %v94_v20  ;;  %1640 = vmatprep.subr.bf16.mxu0 %v2310_v22  ;;  %v2338_v48 = vld [vmem:[%s3446_s3 + $0x194] ss:$28 sps:$4 sm:$0xff]   ;;  %v2344_v52 = vld [vmem:[%s3446_s3 + $0x1cc] ss:$28 sps:$4 sm:$0xff]   ;;  %v2350_v56 = vld [vmem:[%s3446_s3 + $0x204] ss:$28 sps:$4 sm:$0xff]  }
  0x10   :  { %1716 = vmatprep.subr.bf16.mxu1 %v2296_v19  ;;  %v2351_v49 = vld [vmem:[%s3446_s3 + $0x1f8] ss:$28 sps:$4 sm:$0xff]   ;;  %v2336_v50 = vld [vmem:[%s3446_s3 + $0x190] ss:$28 sps:$4 sm:$0xff]   ;;  %v2342_v55 = vld [vmem:[%s3446_s3 + $0x1c8] ss:$28 sps:$4 sm:$0xff]  }
  0x11   :  { %v2352_v51 = vld [vmem:[%s3446_s3 + $0x234] ss:$28 sps:$4 sm:$0xff]   ;;  %v2358_v54 = vld [vmem:[%s3446_s3 + $0x26c] ss:$28 sps:$4 sm:$0xff]   ;;  %v2364_v58 = vld [vmem:[%s3446_s3 + $0x2a4] ss:$28 sps:$4 sm:$0xff]  }
  0x12   :  { %1993 = vmatmul.mubr.msk.bf16.vlgmr.msra.gmra.mrb[4].mxu1 %vm82_vm1, %v23_v12  ;;  %1641 = vmatpush1.bf16.msra.mxu0 %v2315_v25  ;;  %v2357_v53 = vld [vmem:[%s3446_s3 + $0x230] ss:$28 sps:$4 sm:$0xff]   ;;  %v2363_v57 = vld [vmem:[%s3446_s3 + $0x268] ss:$28 sps:$4 sm:$0xff]   ;;  %v2348_v59 = vld [vmem:[%s3446_s3 + $0x200] ss:$28 sps:$4 sm:$0xff]  }
  0x13   :  { %1717 = vmatpush1.bf16.msra.mxu1 %v2294_v23  ;;  %1642 = vmatprep.subr.bf16.mxu0 %v2316_v26  ;;  %v2356_v60 = vld [vmem:[%s3446_s3 + $0x23c] ss:$28 sps:$4 sm:$0xff]   ;;  %v2362_v0 = vld [vmem:[%s3446_s3 + $0x274] ss:$28 sps:$4 sm:$0xff]   ;;  %v2368_v3 = vld [vmem:[%s3446_s3 + $0x2ac] ss:$28 sps:$4 sm:$0xff]  }
  0x14   :  { %1718 = vmatprep.subr.bf16.mxu1 %v2302_v24  ;;  %v2369_v61 = vld [vmem:[%s3446_s3 + $0x2a0] ss:$28 sps:$4 sm:$0xff]   ;;  %v2354_v63 = vld [vmem:[%s3446_s3 + $0x238] ss:$28 sps:$4 sm:$0xff]   ;;  %v2360_v2 = vld [vmem:[%s3446_s3 + $0x270] ss:$28 sps:$4 sm:$0xff]  }
  0x15   :  { %v2370_v62 = vld [vmem:[%s3446_s3 + $0x2dc] ss:$28 sps:$4 sm:$0xff]   ;;  %v2366_v4 = vld [vmem:[%s3446_s3 + $0x2a8] ss:$28 sps:$4 sm:$0xff]   ;;  %v2376_v7 = vld [vmem:[%s3446_s3 + $0x314] ss:$28 sps:$4 sm:$0xff]  }
  0x16   :  { %1643 = vmatpush1.bf16.msra.mxu0 %v2321_v29  ;;  %v2375_v1 = vld [vmem:[%s3446_s3 + $0x2d8] ss:$28 sps:$4 sm:$0xff]   ;;  %v2374_v5 = vld [vmem:[%s3446_s3 + $0x2e4] ss:$28 sps:$4 sm:$0xff]   ;;  %v2381_v10 = vld [vmem:[%s3446_s3 + $0x310] ss:$28 sps:$4 sm:$0xff]  }
  0x17   :  { %1719 = vmatpush1.bf16.msra.mxu1 %v2300_v27  ;;  %1644 = vmatprep.subr.bf16.mxu0 %v2322_v30  ;;  %v2372_v6 = vld [vmem:[%s3446_s3 + $0x2e0] ss:$28 sps:$4 sm:$0xff]   ;;  %v2378_v9 = vld [vmem:[%s3446_s3 + $0x318] ss:$28 sps:$4 sm:$0xff]   ;;  %v2382_v11 = vld [vmem:[%s3446_s3 + $0x34c] ss:$28 sps:$4 sm:$0xff]  }
  0x18   :  { %1720 = vmatprep.subr.bf16.mxu1 %v2308_v28  ;;  %v2380_v8 = vld [vmem:[%s3446_s3 + $0x31c] ss:$28 sps:$4 sm:$0xff]   ;;  %v2386_v12 = vld [vmem:[%s3446_s3 + $0x354] ss:$28 sps:$4 sm:$0xff]   ;;  %v2387_v14 = vld [vmem:[%s3446_s3 + $0x348] ss:$28 sps:$4 sm:$0xff]  }
  0x19   :  { %v2384_v13 = vld [vmem:[%s3446_s3 + $0x350] ss:$28 sps:$4 sm:$0xff]   ;;  %v2390_v15 = vld [vmem:[%s3446_s3 + $0x384] ss:$28 sps:$4 sm:$0xff]  }
  0x1a   :  { %1645 = vmatpush1.bf16.msra.mxu0 %v2327_v33  ;;  %v2393_v16 = vld [vmem:[%s3446_s3 + $0x38c] ss:$28 sps:$4 sm:$0xff]  }
  0x1b   :  { %1721 = vmatpush1.bf16.msra.mxu1 %v2306_v31  ;;  %1646 = vmatprep.subr.bf16.mxu0 %v2328_v34 }
  0x1c   :  { %1722 = vmatprep.subr.bf16.mxu1 %v2314_v32 }
  0x1e   :  { %1647 = vmatpush1.bf16.msra.mxu0 %v2333_v37 }
  0x1f   :  { %1723 = vmatpush1.bf16.msra.mxu1 %v2312_v35  ;;  %1648 = vmatprep.subr.bf16.mxu0 %v2334_v38 }
  0x20   :  { %1724 = vmatprep.subr.bf16.mxu1 %v2320_v36 }
  0x22   :  { %1649 = vmatpush1.bf16.msra.mxu0 %v2339_v41 }
  0x23   :  { %1725 = vmatpush1.bf16.msra.mxu1 %v2318_v39  ;;  %1650 = vmatprep.subr.bf16.mxu0 %v2340_v42 }
  0x24   :  { %1726 = vmatprep.subr.bf16.mxu1 %v2326_v40 }
  0x26   :  { %1651 = vmatpush1.bf16.msra.mxu0 %v2345_v45 }
  0x27   :  { %1727 = vmatpush1.bf16.msra.mxu1 %v2324_v43  ;;  %1652 = vmatprep.subr.bf16.mxu0 %v2346_v46 }
  0x28   :  { %1728 = vmatprep.subr.bf16.mxu1 %v2332_v44 }
  0x2a   :  { %1653 = vmatpush1.bf16.msra.mxu0 %v2351_v49 }
  0x2b   :  { %1729 = vmatpush1.bf16.msra.mxu1 %v2330_v47  ;;  %1654 = vmatprep.subr.bf16.mxu0 %v2352_v51 }
  0x2c   :  { %1730 = vmatprep.subr.bf16.mxu1 %v2338_v48 }
  0x2e   :  { %1655 = vmatpush1.bf16.msra.mxu0 %v2357_v53 }
  0x2f   :  { %1731 = vmatpush1.bf16.msra.mxu1 %v2336_v50  ;;  %1656 = vmatprep.subr.bf16.mxu0 %v2358_v54 }
  0x30   :  { %1732 = vmatprep.subr.bf16.mxu1 %v2344_v52 }
  0x32   :  { %1657 = vmatpush1.bf16.msra.mxu0 %v2363_v57 }
  0x33   :  { %1733 = vmatpush1.bf16.msra.mxu1 %v2342_v55  ;;  %1658 = vmatprep.subr.bf16.mxu0 %v2364_v58 }
  0x34   :  { %1734 = vmatprep.subr.bf16.mxu1 %v2350_v56 }
  0x36   :  { %1659 = vmatpush1.bf16.msra.mxu0 %v2369_v61 }
  0x37   :  { %1735 = vmatpush1.bf16.msra.mxu1 %v2348_v59  ;;  %1660 = vmatprep.subr.bf16.mxu0 %v2370_v62 }
  0x38   :  { %1736 = vmatprep.subr.bf16.mxu1 %v2356_v60 }
  0x3a   :  { %1661 = vmatpush1.bf16.msra.mxu0 %v2375_v1 }
  0x3b   :  { %1737 = vmatpush1.bf16.msra.mxu1 %v2354_v63  ;;  %1662 = vmatprep.subr.bf16.mxu0 %v2376_v7 }
  0x3c   :  { %1738 = vmatprep.subr.bf16.mxu1 %v2362_v0 }
  0x3e   :  { %1663 = vmatpush1.bf16.msra.mxu0 %v2381_v10 }
  0x3f   :  { %1739 = vmatpush1.bf16.msra.mxu1 %v2360_v2  ;;  %1664 = vmatprep.subr.bf16.mxu0 %v2382_v11 }
  0x40   :  { %1740 = vmatprep.subr.bf16.mxu1 %v2368_v3 }
  0x42   :  { %1665 = vmatpush1.bf16.msra.mxu0 %v2387_v14 }
  0x43   :  { %1741 = vmatpush1.bf16.msra.mxu1 %v2366_v4  ;;  %1675 = vmatprep.subr.bf16.mxu0 %v2390_v15 }
  0x44   :  { %1742 = vmatprep.subr.bf16.mxu1 %v2374_v5 }
  0x47   :  { %1743 = vmatpush1.bf16.msra.mxu1 %v2372_v6 }
  0x48   :  { %1744 = vmatprep.subr.bf16.mxu1 %v2380_v8 }
  0x4b   :  { %1745 = vmatpush1.bf16.msra.mxu1 %v2378_v9 }
  0x4c   :  { %1746 = vmatprep.subr.bf16.mxu1 %v2386_v12 }
  0x4f   :  { %1747 = vmatpush1.bf16.msra.mxu1 %v2384_v13 }
  0x50   :  { %1757 = vmatprep.subr.bf16.mxu1 %v2393_v16 }
  0x51   :  { %10 = vsyncpa [#allocation3], 0  ;;  %v32_v17 = vlaneseq  ;;  %v2899_v20 = vld [vmem:[%s3445_s2] sm:$0xf]  ;;  %v2391_v35 = vld [vmem:[%s3446_s3 + $0x388] ss:$28 sps:$4 sm:$0xff]  }
  0x52   :  { %v2388_v34 = vld [vmem:[%s3446_s3 + $0x380] ss:$28 sps:$4 sm:$0xff]   ;;  %v2394_v42 = vld [vmem:[%s3446_s3 + $0x3b8] ss:$28 sps:$4 sm:$0xff]   ;;  %v2400_v50 = vld [vmem:[%s3446_s3 + $0x3f0] ss:$28 sps:$4 sm:$0xff]  }
  0x53   :  { %v2893_v18 = vshrl.u32 %v32_v17, 7  ;;  %v2396_v38 = vld [vmem:[%s3446_s3 + $0x3bc] ss:$28 sps:$4 sm:$0xff]   ;;  %v2399_v39 = vld [vmem:[%s3446_s3 + $0x3c4] ss:$28 sps:$4 sm:$0xff]   ;;  %vm1966_vm2 = vcmask 130048  }
  0x54   :  { %v2397_v43 = vld [vmem:[%s3446_s3 + $0x3c0] ss:$28 sps:$4 sm:$0xff]   ;;  %v2402_v46 = vld [vmem:[%s3446_s3 + $0x3f4] ss:$28 sps:$4 sm:$0xff]   ;;  %v2408_v53 = vld [vmem:[%s3446_s3 + $0x42c] ss:$28 sps:$4 sm:$0xff]  }
  0x55   :  { %v34_v19 = vsub.s32 0, %v2893_v18  ;;  %v38_v21 = vsub.s32 1, %v2893_v18  ;;  %v46_v29 = vsub.s32 3, %v2893_v18  ;;  %v2405_v47 = vld [vmem:[%s3446_s3 + $0x3fc] ss:$28 sps:$4 sm:$0xff]  }
  0x56   :  { %v2403_v51 = vld [vmem:[%s3446_s3 + $0x3f8] ss:$28 sps:$4 sm:$0xff]   ;;  %v2406_v55 = vld [vmem:[%s3446_s3 + $0x428] ss:$28 sps:$4 sm:$0xff]   ;;  %v2409_v56 = vld [vmem:[%s3446_s3 + $0x430] ss:$28 sps:$4 sm:$0xff]  }
  0x57   :  { %v35_v22 = vrot.slane %v2899_v20, %v34_v19  ;;  %v39_v23 = vrot.slane %v2899_v20, %v38_v21  ;;  %v47_v36 = vrot.slane %v2899_v20, %v46_v29  ;;  %v2411_v54 = vld [vmem:[%s3446_s3 + $0x434] ss:$28 sps:$4 sm:$0xff]   ;;  %v2414_v57 = vld [vmem:[%s3446_s3 + $0x464] ss:$28 sps:$4 sm:$0xff]   ;;  %v2417_v58 = vld [vmem:[%s3446_s3 + $0x46c] ss:$28 sps:$4 sm:$0xff]  }
  0x58   :  { %v2412_v59 = vld [vmem:[%s3446_s3 + $0x460] ss:$28 sps:$4 sm:$0xff]   ;;  %v2415_v60 = vld [vmem:[%s3446_s3 + $0x468] ss:$28 sps:$4 sm:$0xff]   ;;  %v2418_v63 = vld [vmem:[%s3446_s3 + $0x498] ss:$28 sps:$4 sm:$0xff]  }
  0x59   :  { %v2420_v61 = vld [vmem:[%s3446_s3 + $0x49c] ss:$28 sps:$4 sm:$0xff]   ;;  %v2423_v62 = vld [vmem:[%s3446_s3 + $0x4a4] ss:$28 sps:$4 sm:$0xff]   ;;  %v2426_v1 = vld [vmem:[%s3446_s3 + $0x4d4] ss:$28 sps:$4 sm:$0xff]  }
  0x5a   :  { %v2421_v0 = vld [vmem:[%s3446_s3 + $0x4a0] ss:$28 sps:$4 sm:$0xff]   ;;  %v2424_v3 = vld [vmem:[%s3446_s3 + $0x4d0] ss:$28 sps:$4 sm:$0xff]   ;;  %v2427_v4 = vld [vmem:[%s3446_s3 + $0x4d8] ss:$28 sps:$4 sm:$0xff]  }
  0x5b   :  { %v2429_v2 = vld [vmem:[%s3446_s3 + $0x4dc] ss:$28 sps:$4 sm:$0xff]   ;;  %v2432_v5 = vld [vmem:[%s3446_s3 + $0x50c] ss:$28 sps:$4 sm:$0xff]   ;;  %v2435_v6 = vld [vmem:[%s3446_s3 + $0x514] ss:$28 sps:$4 sm:$0xff]  }
  0x5c   :  { %v2430_v7 = vld [vmem:[%s3446_s3 + $0x508] ss:$28 sps:$4 sm:$0xff]   ;;  %v2433_v8 = vld [vmem:[%s3446_s3 + $0x510] ss:$28 sps:$4 sm:$0xff]   ;;  %v2436_v11 = vld [vmem:[%s3446_s3 + $0x540] ss:$28 sps:$4 sm:$0xff]  }
  0x5d   :  { %v2438_v9 = vld [vmem:[%s3446_s3 + $0x544] ss:$28 sps:$4 sm:$0xff]   ;;  %v2441_v10 = vld [vmem:[%s3446_s3 + $0x54c] ss:$28 sps:$4 sm:$0xff]   ;;  %v2444_v13 = vld [vmem:[%s3446_s3 + $0x57c] ss:$28 sps:$4 sm:$0xff]  }
  0x5e   :  { %v2439_v12 = vld [vmem:[%s3446_s3 + $0x548] ss:$28 sps:$4 sm:$0xff]   ;;  %v2442_v15 = vld [vmem:[%s3446_s3 + $0x578] ss:$28 sps:$4 sm:$0xff]   ;;  %v2445_v16 = vld [vmem:[%s3446_s3 + $0x580] ss:$28 sps:$4 sm:$0xff]  }
  0x5f   :  { %v2447_v14 = vld [vmem:[%s3446_s3 + $0x584] ss:$28 sps:$4 sm:$0xff]   ;;  %v2450_v17 = vld [vmem:[%s3446_s3 + $0x5b4] ss:$28 sps:$4 sm:$0xff]  }
  0xdd   :  { %v133_v24 = vpop.f32.mrb[0].mxu1 }
  0xde   :  { %v134_v25 = vadd.f32 %v133_v24, %v35_v22  ;;  %v135_v26 = vpop.f32.mrb[1].mxu1  ;;  %v2453_v22 = vld [vmem:[%s3446_s3 + $0x5bc] ss:$28 sps:$4 sm:$0xff]  }
  0xdf   :  { %v136_v27 = vadd.f32 %v135_v26, %v39_v23  ;;  %v137_v28 = vpop.f32.mrb[2].mxu1  ;;  %v2448_v23 = vld [vmem:[%s3446_s3 + $0x5b0] ss:$28 sps:$4 sm:$0xff]   ;;  %v2451_v24 = vld [vmem:[%s3446_s3 + $0x5b8] ss:$28 sps:$4 sm:$0xff]  }
  0xe0   :  { %v181_v30 = vmax.f32 %v134_v25, 0.0  ;;  %v138_v31 = vpop.f32.mrb[3].mxu1  ;;  %v2456_v25 = vld [vmem:[%s3446_s3 + $0x5ec] ss:$28 sps:$4 sm:$0xff]   ;;  %v2459_v26 = vld [vmem:[%s3446_s3 + $0x5f4] ss:$28 sps:$4 sm:$0xff]  }
  0xe1   :  { %v182_v32 = vmax.f32 %v136_v27, 0.0  ;;  %v2454_v27 = vld [vmem:[%s3446_s3 + $0x5e8] ss:$28 sps:$4 sm:$0xff]   ;;  %v2457_v28 = vld [vmem:[%s3446_s3 + $0x5f0] ss:$28 sps:$4 sm:$0xff]  }
  0xe2   :  { %v2920_v37 = vpack.c.bf16 %v181_v30, %v181_v30  ;;  %v2462_v30 = vld [vmem:[%s3446_s3 + $0x624] ss:$28 sps:$4 sm:$0xff]   ;;  %v2465_v31 = vld [vmem:[%s3446_s3 + $0x62c] ss:$28 sps:$4 sm:$0xff]  }
  0xe3   :  { %v2909_v33 = vpack.c.bf16 %v182_v32, %v182_v32  ;;  %v42_v32 = vsub.s32 2, %v2893_v18 }
  0xe5   :  { %1666 = vmatprep.mubr.bf16.mxu0 %v2909_v33  ;;  %1748 = vmatprep.mubr.bf16.mxu1 %v2909_v33  ;;  %v2930_v40 = vpop.f32.mrb[4].mxu1 }
  0xe6   :  { %1667 = vmatmul.mubr.bf16.vlgmr.msra.gmra.mrb[0].mxu0 %v2920_v37  ;;  %1749 = vmatmul.mubr.bf16.vlgmr.msra.gmra.mrb[8].mxu1 %v2920_v37  ;;  %v176_v41 = vpop.f32.mrb[5].mxu1 }
  0xe7   :  { %1676 = vmatpush1.bf16.msra.mxu0 %v2388_v34  ;;  %1758 = vmatpush1.bf16.msra.mxu1 %v2391_v35  ;;  %v177_v44 = vadd.f32 %v176_v41, %v47_v36  ;;  %v178_v45 = vpop.f32.mrb[6].mxu1  ;;  %v2460_v34 = vld [vmem:[%s3446_s3 + $0x620] ss:$28 sps:$4 sm:$0xff]   ;;  %v2463_v35 = vld [vmem:[%s3446_s3 + $0x628] ss:$28 sps:$4 sm:$0xff]  }
  0xe8   :  { %1677 = vmatprep.subr.bf16.mxu0 %v2396_v38  ;;  %1759 = vmatprep.subr.bf16.mxu1 %v2399_v39  ;;  %v179_v48 = vpop.f32.mrb[7].mxu1  ;;  %v2468_v36 = vld [vmem:[%s3446_s3 + $0x65c] ss:$28 sps:$4 sm:$0xff]   ;;  %v2471_v38 = vld [vmem:[%s3446_s3 + $0x664] ss:$28 sps:$4 sm:$0xff]   ;;  %v43_v39 = vrot.slane %v2899_v20, %v42_v32 }
  0xe9   :  { %v184_v49 = vmax.f32 %v177_v44, 0.0  ;;  %v2466_v41 = vld [vmem:[%s3446_s3 + $0x658] ss:$28 sps:$4 sm:$0xff]   ;;  %v2472_v45 = vld [vmem:[%s3446_s3 + $0x690] ss:$28 sps:$4 sm:$0xff]  }
  0xea   :  { %v2477_v20 = vld [vmem:[%s3446_s3 + $0x69c] ss:$28 sps:$4 sm:$0xff]   ;;  %v175_v44 = vadd.f32 %v2930_v40, %v43_v39  ;;  %v2483_v40 = vld [vmem:[%s3446_s3 + $0x6d4] ss:$28 sps:$4 sm:$0xff]   ;;  %v2538_v39 = vld [vmem:[%s3446_s3 + $0x408] ss:$28 sps:$4 sm:$0xff]  }
  0xeb   :  { %1678 = vmatpush1.bf16.msra.mxu0 %v2394_v42  ;;  %1760 = vmatpush1.bf16.msra.mxu1 %v2397_v43  ;;  %v2952_v52 = vpack.c.bf16 %v184_v49, %v184_v49  ;;  %v2469_v42 = vld [vmem:[%s3446_s3 + $0x660] ss:$28 sps:$4 sm:$0xff]   ;;  %v2474_v43 = vld [vmem:[%s3446_s3 + $0x694] ss:$28 sps:$4 sm:$0xff]   ;;  %v2478_v49 = vld [vmem:[%s3446_s3 + $0x6c8] ss:$28 sps:$4 sm:$0xff]  }
  0xec   :  { %1679 = vmatprep.subr.bf16.mxu0 %v2402_v46  ;;  %1761 = vmatprep.subr.bf16.mxu1 %v2405_v47  ;;  %v2475_v46 = vld [vmem:[%s3446_s3 + $0x698] ss:$28 sps:$4 sm:$0xff]   ;;  %v2480_v47 = vld [vmem:[%s3446_s3 + $0x6cc] ss:$28 sps:$4 sm:$0xff]   ;;  %v183_v48 = vmax.f32 %v175_v44, 0.0 }
  0xed   :  { %1707 = vmatprep.mubr.bf16.mxu0 %v2952_v52  ;;  %1789 = vmatprep.mubr.bf16.mxu1 %v2952_v52  ;;  %v2546_v44 = vld [vmem:[%s3446_s3 + $0x2b4] ss:$28 sps:$4 sm:$0xff]  }
  0xef   :  { %1680 = vmatpush1.bf16.msra.mxu0 %v2400_v50  ;;  %1762 = vmatpush1.bf16.msra.mxu1 %v2403_v51  ;;  %v2481_v50 = vld [vmem:[%s3446_s3 + $0x6d0] ss:$28 sps:$4 sm:$0xff]  }
  0xf0   :  { %1681 = vmatprep.subr.bf16.mxu0 %v2408_v53  ;;  %1763 = vmatprep.subr.bf16.mxu1 %v2411_v54  ;;  %v2486_v51 = vld [vmem:[%s3446_s3 + $0x14] ss:$28 sps:$4 sm:$0xff]   ;;  %v3123_v54 = vpack.c.bf16 %v183_v48, %v183_v48 }
  0xf1   :  { %v2487_v53 = vld [vmem:[%s3446_s3 + $0x1d8] ss:$28 sps:$4 sm:$0xff]   ;;  %v2552_v48 = vld [vmem:[%s3446_s3 + $0x670] ss:$28 sps:$4 sm:$0xff]  }
  0xf3   :  { %1682 = vmatpush1.bf16.msra.mxu0 %v2406_v55  ;;  %1764 = vmatpush1.bf16.msra.mxu1 %v2409_v56  ;;  %v2484_v55 = vld [vmem:[%s3446_s3 + $0x10] ss:$28 sps:$4 sm:$0xff]   ;;  %v2488_v56 = vld [vmem:[%s3446_s3 + $0x18] ss:$28 sps:$4 sm:$0xff]  }
  0xf4   :  { %1683 = vmatprep.subr.bf16.mxu0 %v2414_v57  ;;  %1765 = vmatprep.subr.bf16.mxu1 %v2417_v58  ;;  %v2491_v57 = vld [vmem:[%s3446_s3 + $0x4c] ss:$28 sps:$4 sm:$0xff]  }
  0xf5   :  { %v2492_v58 = vld [vmem:[%s3446_s3 + $0x210] ss:$28 sps:$4 sm:$0xff]  }
  0xf7   :  { %1684 = vmatpush1.bf16.msra.mxu0 %v2412_v59  ;;  %1766 = vmatpush1.bf16.msra.mxu1 %v2415_v60  ;;  %v2489_v59 = vld [vmem:[%s3446_s3 + $0x48] ss:$28 sps:$4 sm:$0xff]   ;;  %v2493_v60 = vld [vmem:[%s3446_s3 + $0x50] ss:$28 sps:$4 sm:$0xff]  }
  0xf8   :  { %1685 = vmatprep.subr.bf16.mxu0 %v2420_v61  ;;  %1767 = vmatprep.subr.bf16.mxu1 %v2423_v62  ;;  %v2496_v61 = vld [vmem:[%s3446_s3 + $0x84] ss:$28 sps:$4 sm:$0xff]  }
  0xf9   :  { %v2497_v62 = vld [vmem:[%s3446_s3 + $0x248] ss:$28 sps:$4 sm:$0xff]  }
  0xfb   :  { %1686 = vmatpush1.bf16.msra.mxu0 %v2418_v63  ;;  %1768 = vmatpush1.bf16.msra.mxu1 %v2421_v0  ;;  %v2494_v63 = vld [vmem:[%s3446_s3 + $0x80] ss:$28 sps:$4 sm:$0xff]  }
  0xfc   :  { %1687 = vmatprep.subr.bf16.mxu0 %v2426_v1  ;;  %1769 = vmatprep.subr.bf16.mxu1 %v2429_v2  ;;  %v2501_v0 = vld [vmem:[%s3446_s3 + $0xbc] ss:$28 sps:$4 sm:$0xff]  }
  0xfd   :  { %v2502_v1 = vld [vmem:[%s3446_s3 + $0x280] ss:$28 sps:$4 sm:$0xff]   ;;  %v2499_v2 = vld [vmem:[%s3446_s3 + $0xb8] ss:$28 sps:$4 sm:$0xff]  }
  0xff   :  { %1688 = vmatpush1.bf16.msra.mxu0 %v2424_v3  ;;  %1770 = vmatpush1.bf16.msra.mxu1 %v2427_v4  ;;  %v2503_v3 = vld [vmem:[%s3446_s3 + $0xc0] ss:$28 sps:$4 sm:$0xff]   ;;  %v2506_v4 = vld [vmem:[%s3446_s3 + $0xf4] ss:$28 sps:$4 sm:$0xff]  }
 0x100   :  { %1689 = vmatprep.subr.bf16.mxu0 %v2432_v5  ;;  %1771 = vmatprep.subr.bf16.mxu1 %v2435_v6  ;;  %v2507_v5 = vld [vmem:[%s3446_s3 + $0x2b8] ss:$28 sps:$4 sm:$0xff]   ;;  %v2504_v6 = vld [vmem:[%s3446_s3 + $0xf0] ss:$28 sps:$4 sm:$0xff]  }
 0x103   :  { %1690 = vmatpush1.bf16.msra.mxu0 %v2430_v7  ;;  %1772 = vmatpush1.bf16.msra.mxu1 %v2433_v8  ;;  %v2508_v7 = vld [vmem:[%s3446_s3 + $0xf8] ss:$28 sps:$4 sm:$0xff]   ;;  %v2511_v8 = vld [vmem:[%s3446_s3 + $0x12c] ss:$28 sps:$4 sm:$0xff]  }
 0x104   :  { %1691 = vmatprep.subr.bf16.mxu0 %v2438_v9  ;;  %1773 = vmatprep.subr.bf16.mxu1 %v2441_v10  ;;  %v2512_v9 = vld [vmem:[%s3446_s3 + $0x2f0] ss:$28 sps:$4 sm:$0xff]   ;;  %v2509_v10 = vld [vmem:[%s3446_s3 + $0x128] ss:$28 sps:$4 sm:$0xff]  }
 0x107   :  { %1692 = vmatpush1.bf16.msra.mxu0 %v2436_v11  ;;  %1774 = vmatpush1.bf16.msra.mxu1 %v2439_v12  ;;  %v2513_v11 = vld [vmem:[%s3446_s3 + $0x130] ss:$28 sps:$4 sm:$0xff]   ;;  %v2516_v12 = vld [vmem:[%s3446_s3 + $0x164] ss:$28 sps:$4 sm:$0xff]  }
 0x108   :  { %1693 = vmatprep.subr.bf16.mxu0 %v2444_v13  ;;  %1775 = vmatprep.subr.bf16.mxu1 %v2447_v14  ;;  %v2517_v13 = vld [vmem:[%s3446_s3 + $0x328] ss:$28 sps:$4 sm:$0xff]   ;;  %v2514_v14 = vld [vmem:[%s3446_s3 + $0x160] ss:$28 sps:$4 sm:$0xff]  }
 0x10b   :  { %1694 = vmatpush1.bf16.msra.mxu0 %v2442_v15  ;;  %1776 = vmatpush1.bf16.msra.mxu1 %v2445_v16  ;;  %v2518_v15 = vld [vmem:[%s3446_s3 + $0x168] ss:$28 sps:$4 sm:$0xff]   ;;  %v2521_v16 = vld [vmem:[%s3446_s3 + $0x19c] ss:$28 sps:$4 sm:$0xff]  }
 0x10c   :  { %1695 = vmatprep.subr.bf16.mxu0 %v2450_v17  ;;  %1777 = vmatprep.subr.bf16.mxu1 %v2453_v22  ;;  %v2522_v17 = vld [vmem:[%s3446_s3 + $0x360] ss:$28 sps:$4 sm:$0xff]   ;;  %v2519_v22 = vld [vmem:[%s3446_s3 + $0x198] ss:$28 sps:$4 sm:$0xff]  }
 0x10f   :  { %1696 = vmatpush1.bf16.msra.mxu0 %v2448_v23  ;;  %1778 = vmatpush1.bf16.msra.mxu1 %v2451_v24  ;;  %v2523_v23 = vld [vmem:[%s3446_s3 + $0x1a0] ss:$28 sps:$4 sm:$0xff]   ;;  %v2526_v24 = vld [vmem:[%s3446_s3 + $0x1d4] ss:$28 sps:$4 sm:$0xff]  }
 0x110   :  { %1697 = vmatprep.subr.bf16.mxu0 %v2456_v25  ;;  %1779 = vmatprep.subr.bf16.mxu1 %v2459_v26  ;;  %v2527_v25 = vld [vmem:[%s3446_s3 + $0x558] ss:$28 sps:$4 sm:$0xff]   ;;  %v2524_v26 = vld [vmem:[%s3446_s3 + $0x1d0] ss:$28 sps:$4 sm:$0xff]  }
 0x113   :  { %1698 = vmatpush1.bf16.msra.mxu0 %v2454_v27  ;;  %1780 = vmatpush1.bf16.msra.mxu1 %v2457_v28  ;;  %v2528_v27 = vld [vmem:[%s3446_s3 + $0x398] ss:$28 sps:$4 sm:$0xff]   ;;  %v2531_v28 = vld [vmem:[%s3446_s3 + $0x20c] ss:$28 sps:$4 sm:$0xff]  }
 0x114   :  { %1699 = vmatprep.subr.bf16.mxu0 %v2462_v30  ;;  %1781 = vmatprep.subr.bf16.mxu1 %v2465_v31  ;;  %v2532_v30 = vld [vmem:[%s3446_s3 + $0x590] ss:$28 sps:$4 sm:$0xff]   ;;  %v2529_v31 = vld [vmem:[%s3446_s3 + $0x208] ss:$28 sps:$4 sm:$0xff]  }
 0x117   :  { %1700 = vmatpush1.bf16.msra.mxu0 %v2460_v34  ;;  %1782 = vmatpush1.bf16.msra.mxu1 %v2463_v35  ;;  %v2533_v34 = vld [vmem:[%s3446_s3 + $0x3d0] ss:$28 sps:$4 sm:$0xff]   ;;  %v2536_v35 = vld [vmem:[%s3446_s3 + $0x244] ss:$28 sps:$4 sm:$0xff]  }
 0x118   :  { %1701 = vmatprep.subr.bf16.mxu0 %v2468_v36  ;;  %1783 = vmatprep.subr.bf16.mxu1 %v2471_v38  ;;  %v2537_v36 = vld [vmem:[%s3446_s3 + $0x5c8] ss:$28 sps:$4 sm:$0xff]   ;;  %v2534_v38 = vld [vmem:[%s3446_s3 + $0x240] ss:$28 sps:$4 sm:$0xff]  }
 0x11b   :  { %1702 = vmatpush1.bf16.msra.mxu0 %v2466_v41  ;;  %1784 = vmatpush1.bf16.msra.mxu1 %v2469_v42  ;;  %v2541_v41 = vld [vmem:[%s3446_s3 + $0x27c] ss:$28 sps:$4 sm:$0xff]  }
 0x11c   :  { %1703 = vmatprep.subr.bf16.mxu0 %v2474_v43  ;;  %1785 = vmatprep.subr.bf16.mxu1 %v2477_v20  ;;  %v2542_v42 = vld [vmem:[%s3446_s3 + $0x600] ss:$28 sps:$4 sm:$0xff]   ;;  %v2539_v43 = vld [vmem:[%s3446_s3 + $0x278] ss:$28 sps:$4 sm:$0xff]  }
 0x11d   :  { %v2543_v20 = vld [vmem:[%s3446_s3 + $0x440] ss:$28 sps:$4 sm:$0xff]  }
 0x11f   :  { %1704 = vmatpush1.bf16.msra.mxu0 %v2472_v45  ;;  %1786 = vmatpush1.bf16.msra.mxu1 %v2475_v46  ;;  %v2547_v45 = vld [vmem:[%s3446_s3 + $0x638] ss:$28 sps:$4 sm:$0xff]   ;;  %v2544_v46 = vld [vmem:[%s3446_s3 + $0x2b0] ss:$28 sps:$4 sm:$0xff]  }
 0x120   :  { %1705 = vmatprep.subr.bf16.mxu0 %v2480_v47  ;;  %1787 = vmatprep.subr.bf16.mxu1 %v2483_v40  ;;  %v2548_v47 = vld [vmem:[%s3446_s3 + $0x478] ss:$28 sps:$4 sm:$0xff]   ;;  %v2551_v40 = vld [vmem:[%s3446_s3 + $0x2ec] ss:$28 sps:$4 sm:$0xff]  }
 0x123   :  { %1706 = vmatpush1.bf16.msra.mxu0 %v2478_v49  ;;  %1788 = vmatpush1.bf16.msra.mxu1 %v2481_v50  ;;  %v2549_v49 = vld [vmem:[%s3446_s3 + $0x2e8] ss:$28 sps:$4 sm:$0xff]   ;;  %v2553_v50 = vld [vmem:[%s3446_s3 + $0x4b0] ss:$28 sps:$4 sm:$0xff]  }
 0x124   :  { %1798 = vmatprep.subr.bf16.mxu0 %v2486_v51  ;;  %2218 = vmatprep.subr.bf16.mxu1 %v2487_v53  ;;  %v2556_v51 = vld [vmem:[%s3446_s3 + $0x324] ss:$28 sps:$4 sm:$0xff]  }
 0x125   :  { %v2557_v53 = vld [vmem:[%s3446_s3 + $0x6a8] ss:$28 sps:$4 sm:$0xff]  }
 0x126   :  { %1708 = vmatmul.mubr.bf16.vlgmr.msra.gmra.mrb[0].mxu0 %v3123_v54  ;;  %1790 = vmatmul.mubr.bf16.vlgmr.msra.gmra.mrb[8].mxu1 %v3123_v54 }
 0x127   :  { %1799 = vmatpush1.bf16.msra.mxu0 %v2484_v55  ;;  %1830 = vmatprep.mubr.bf16.mxu0 %v2909_v33  ;;  %v2554_v55 = vld [vmem:[%s3446_s3 + $0x320] ss:$28 sps:$4 sm:$0xff]  }
 0x128   :  { %2219 = vmatpush3.bf16.msra.mxu1 %v2488_v56  ;;  %1912 = vmatprep.mubr.bf16.mxu1 %v2909_v33  ;;  %v2498_v33 = vld [vmem:[%s3446_s3 + $0x88] ss:$28 sps:$4 sm:$0xff]  }
 0x129   :  { %1800 = vmatprep.subr.bf16.mxu0 %v2491_v57  ;;  %2220 = vmatprep.subr.bf16.mxu1 %v2492_v58  ;;  %v2558_v56 = vld [vmem:[%s3446_s3 + $0x4e8] ss:$28 sps:$4 sm:$0xff]   ;;  %v2561_v57 = vld [vmem:[%s3446_s3 + $0x35c] ss:$28 sps:$4 sm:$0xff]  }
 0x12a   :  { %v2562_v58 = vld [vmem:[%s3446_s3 + $0x6e0] ss:$28 sps:$4 sm:$0xff]  }
 0x12b   :  { %1801 = vmatpush1.bf16.msra.mxu0 %v2489_v59  ;;  %v2559_v59 = vld [vmem:[%s3446_s3 + $0x358] ss:$28 sps:$4 sm:$0xff]  }
 0x12c   :  { %2221 = vmatpush3.bf16.msra.mxu1 %v2493_v60  ;;  %1802 = vmatprep.subr.bf16.mxu0 %v2496_v61  ;;  %v2563_v60 = vld [vmem:[%s3446_s3 + $0x520] ss:$28 sps:$4 sm:$0xff]   ;;  %v2566_v61 = vld [vmem:[%s3446_s3 + $0x394] ss:$28 sps:$4 sm:$0xff]  }
 0x12d   :  { %2222 = vmatprep.subr.bf16.mxu1 %v2497_v62  ;;  %v2564_v62 = vld [vmem:[%s3446_s3 + $0x390] ss:$28 sps:$4 sm:$0xff]  }
 0x12f   :  { %1803 = vmatpush1.bf16.msra.mxu0 %v2494_v63  ;;  %v2569_v63 = vld [vmem:[%s3446_s3 + $0x3cc] ss:$28 sps:$4 sm:$0xff]  }
 0x130   :  { %2223 = vmatpush3.bf16.msra.mxu1 %v2498_v33  ;;  %1804 = vmatprep.subr.bf16.mxu0 %v2501_v0  ;;  %v2567_v33 = vld [vmem:[%s3446_s3 + $0x3c8] ss:$28 sps:$4 sm:$0xff]  }
 0x131   :  { %2224 = vmatprep.subr.bf16.mxu1 %v2502_v1  ;;  %v2572_v0 = vld [vmem:[%s3446_s3 + $0x404] ss:$28 sps:$4 sm:$0xff]  }
 0x132   :  { %v2570_v1 = vld [vmem:[%s3446_s3 + $0x400] ss:$28 sps:$4 sm:$0xff]  }
 0x133   :  { %1805 = vmatpush1.bf16.msra.mxu0 %v2499_v2  ;;  %v2578_v2 = vld [vmem:[%s3446_s3 + $0x474] ss:$28 sps:$4 sm:$0xff]  }
 0x134   :  { %2225 = vmatpush3.bf16.msra.mxu1 %v2503_v3  ;;  %1806 = vmatprep.subr.bf16.mxu0 %v2506_v4  ;;  %v2576_v3 = vld [vmem:[%s3446_s3 + $0x470] ss:$28 sps:$4 sm:$0xff]  }
 0x135   :  { %2226 = vmatprep.subr.bf16.mxu1 %v2507_v5  ;;  %v2581_v4 = vld [vmem:[%s3446_s3 + $0x4ac] ss:$28 sps:$4 sm:$0xff]  }
 0x136   :  { %v2579_v5 = vld [vmem:[%s3446_s3 + $0x4a8] ss:$28 sps:$4 sm:$0xff]  }
 0x137   :  { %1807 = vmatpush1.bf16.msra.mxu0 %v2504_v6  ;;  %v2584_v6 = vld [vmem:[%s3446_s3 + $0x4e4] ss:$28 sps:$4 sm:$0xff]  }
 0x138   :  { %2227 = vmatpush3.bf16.msra.mxu1 %v2508_v7  ;;  %1808 = vmatprep.subr.bf16.mxu0 %v2511_v8  ;;  %v2582_v7 = vld [vmem:[%s3446_s3 + $0x4e0] ss:$28 sps:$4 sm:$0xff]  }
 0x139   :  { %2228 = vmatprep.subr.bf16.mxu1 %v2512_v9  ;;  %v2587_v8 = vld [vmem:[%s3446_s3 + $0x51c] ss:$28 sps:$4 sm:$0xff]  }
 0x13a   :  { %v2585_v9 = vld [vmem:[%s3446_s3 + $0x518] ss:$28 sps:$4 sm:$0xff]  }
 0x13b   :  { %1809 = vmatpush1.bf16.msra.mxu0 %v2509_v10  ;;  %v2590_v10 = vld [vmem:[%s3446_s3 + $0x554] ss:$28 sps:$4 sm:$0xff]  }
 0x13c   :  { %2229 = vmatpush3.bf16.msra.mxu1 %v2513_v11  ;;  %1810 = vmatprep.subr.bf16.mxu0 %v2516_v12  ;;  %v2588_v11 = vld [vmem:[%s3446_s3 + $0x550] ss:$28 sps:$4 sm:$0xff]  }
 0x13d   :  { %2230 = vmatprep.subr.bf16.mxu1 %v2517_v13  ;;  %v2593_v12 = vld [vmem:[%s3446_s3 + $0x58c] ss:$28 sps:$4 sm:$0xff]  }
 0x13e   :  { %v2591_v13 = vld [vmem:[%s3446_s3 + $0x588] ss:$28 sps:$4 sm:$0xff]  }
 0x13f   :  { %1811 = vmatpush1.bf16.msra.mxu0 %v2514_v14  ;;  %v2596_v14 = vld [vmem:[%s3446_s3 + $0x5c4] ss:$28 sps:$4 sm:$0xff]  }
 0x140   :  { %2231 = vmatpush3.bf16.msra.mxu1 %v2518_v15  ;;  %1812 = vmatprep.subr.bf16.mxu0 %v2521_v16  ;;  %v2594_v15 = vld [vmem:[%s3446_s3 + $0x5c0] ss:$28 sps:$4 sm:$0xff]  }
 0x141   :  { %2232 = vmatprep.subr.bf16.mxu1 %v2522_v17  ;;  %v2599_v16 = vld [vmem:[%s3446_s3 + $0x5fc] ss:$28 sps:$4 sm:$0xff]  }
 0x142   :  { %v2597_v17 = vld [vmem:[%s3446_s3 + $0x5f8] ss:$28 sps:$4 sm:$0xff]  }
 0x143   :  { %1813 = vmatpush1.bf16.msra.mxu0 %v2519_v22  ;;  %v2602_v22 = vld [vmem:[%s3446_s3 + $0x634] ss:$28 sps:$4 sm:$0xff]  }
 0x144   :  { %2233 = vmatpush3.bf16.msra.mxu1 %v2523_v23  ;;  %1814 = vmatprep.subr.bf16.mxu0 %v2526_v24  ;;  %v2600_v23 = vld [vmem:[%s3446_s3 + $0x630] ss:$28 sps:$4 sm:$0xff]  }
 0x145   :  { %2240 = vmatprep.subr.bf16.mxu1 %v2527_v25  ;;  %v2605_v24 = vld [vmem:[%s3446_s3 + $0x66c] ss:$28 sps:$4 sm:$0xff]  }
 0x146   :  { %v2603_v25 = vld [vmem:[%s3446_s3 + $0x668] ss:$28 sps:$4 sm:$0xff]  }
 0x147   :  { %1913 = vmatmul.mubr.bf16.vlgmr.msra.gmra.mrb[12].mxu1 %v2920_v37  ;;  %1815 = vmatpush1.bf16.msra.mxu0 %v2524_v26  ;;  %v2608_v26 = vld [vmem:[%s3446_s3 + $0x6a4] ss:$28 sps:$4 sm:$0xff]  }
 0x148   :  { %2241 = vmatpush3.bf16.msra.mxu1 %v2528_v27  ;;  %1952 = vmatprep.mubr.bf16.mxu1 %v2952_v52  ;;  %v2606_v27 = vld [vmem:[%s3446_s3 + $0x6a0] ss:$28 sps:$4 sm:$0xff]  }
 0x149   :  { %1816 = vmatprep.subr.bf16.mxu0 %v2531_v28  ;;  %2242 = vmatprep.subr.bf16.mxu1 %v2532_v30  ;;  %v2611_v28 = vld [vmem:[%s3446_s3 + $0x6dc] ss:$28 sps:$4 sm:$0xff]  }
 0x14a   :  { %v2609_v30 = vld [vmem:[%s3446_s3 + $0x6d8] ss:$28 sps:$4 sm:$0xff]  }
 0x14b   :  { %1817 = vmatpush1.bf16.msra.mxu0 %v2529_v31  ;;  %v445_v31 = vld [vmem:[%s3447_s4] sm:$0x7f] }
 0x14c   :  { %2243 = vmatpush3.bf16.msra.mxu1 %v2533_v34  ;;  %1818 = vmatprep.subr.bf16.mxu0 %v2536_v35  ;;  %v450_v34 = vrot.slane %v445_v31, %v34_v19  ;;  %v458_v35 = vrot.slane %v445_v31, %v42_v32 }
 0x14d   :  { %2244 = vmatprep.subr.bf16.mxu1 %v2537_v36  ;;  %v454_v36 = vrot.slane %v445_v31, %v38_v21 }
 0x14f   :  { %1819 = vmatpush1.bf16.msra.mxu0 %v2534_v38  ;;  %v462_v38 = vrot.slane %v445_v31, %v46_v29 }
 0x150   :  { %2245 = vmatpush3.bf16.msra.mxu1 %v2538_v39  ;;  %1820 = vmatprep.subr.bf16.mxu0 %v2541_v41 }
 0x151   :  { %2246 = vmatprep.subr.bf16.mxu1 %v2542_v42 }
 0x153   :  { %1821 = vmatpush1.bf16.msra.mxu0 %v2539_v43 }
 0x154   :  { %2247 = vmatpush3.bf16.msra.mxu1 %v2543_v20  ;;  %1822 = vmatprep.subr.bf16.mxu0 %v2546_v44 }
 0x155   :  { %2248 = vmatprep.subr.bf16.mxu1 %v2547_v45 }
 0x157   :  { %1823 = vmatpush1.bf16.msra.mxu0 %v2544_v46 }
 0x158   :  { %2249 = vmatpush3.bf16.msra.mxu1 %v2548_v47  ;;  %1824 = vmatprep.subr.bf16.mxu0 %v2551_v40 }
 0x159   :  { %2250 = vmatprep.subr.bf16.mxu1 %v2552_v48 }
 0x15b   :  { %1825 = vmatpush1.bf16.msra.mxu0 %v2549_v49 }
 0x15c   :  { %2251 = vmatpush3.bf16.msra.mxu1 %v2553_v50  ;;  %1826 = vmatprep.subr.bf16.mxu0 %v2556_v51  ;;  %v473_v50 = vsub.s32 6, %v2893_v18 }
 0x15d   :  { %2252 = vmatprep.subr.bf16.mxu1 %v2557_v53 }
 0x15e   :  { %v474_v51 = vrot.slane %v445_v31, %v473_v50 }
 0x15f   :  { %1827 = vmatpush1.bf16.msra.mxu0 %v2554_v55 }
 0x160   :  { %2253 = vmatpush3.bf16.msra.mxu1 %v2558_v56  ;;  %1828 = vmatprep.subr.bf16.mxu0 %v2561_v57 }
 0x161   :  { %2254 = vmatprep.subr.bf16.mxu1 %v2562_v58 }
 0x163   :  { %1829 = vmatpush1.bf16.msra.mxu0 %v2559_v59 }
 0x164   :  { %2255 = vmatpush3.bf16.msra.mxu1 %v2563_v60  ;;  %1839 = vmatprep.subr.bf16.mxu0 %v2566_v61  ;;  %v465_v61 = vsub.s32 4, %v2893_v18 }
 0x166   :  { %1831 = vmatmul.mubr.bf16.vlgmr.msra.gmra.mrb[4].mxu0 %v2920_v37  ;;  %v2575_v37 = vld [vmem:[%s3446_s3 + $0x43c] ss:$28 sps:$4 sm:$0xff]  }
 0x167   :  { %1953 = vmatmul.mubr.bf16.vlgmr.msra.gmra.mrb[16].mxu1 %v3123_v54  ;;  %1840 = vmatpush1.bf16.msra.mxu0 %v2564_v62  ;;  %v469_v62 = vsub.s32 5, %v2893_v18 }
 0x168   :  { %1871 = vmatprep.mubr.bf16.mxu0 %v2952_v52  ;;  %1841 = vmatprep.subr.bf16.mxu0 %v2569_v63  ;;  %v2573_v52 = vld [vmem:[%s3446_s3 + $0x438] ss:$28 sps:$4 sm:$0xff]   ;;  %v466_v63 = vrot.slane %v445_v31, %v465_v61  ;;  %s2637_s3 = smov [#allocation2]  }
 0x169   :  { %s1974_s4 = sshll.u32 %s2637_s3, 4  ;;  %s1975_s4 = int_to_ptr.vmem [resolvable:$true] %s1974_s4 }
 0x16a   :  { %s2612_s1 = scalar_lea.vmem %s1975_s4, 896  ;;  %p2617_p1 = scmp.lt.s32.totalorder %s1975_s4, %s1975_s4 }
 0x16b   :  { %1842 = vmatpush1.bf16.msra.mxu0 %v2567_v33  ;;  %v470_v33 = vrot.slane %v445_v31, %v469_v62  ;;  %p2613_p0 = scmp.ne.s32.totalorder %s1975_s4, %s2612_s1  ;;  %p2618_p2 = scmp.lt.s32.totalorder %s2612_s1, %s2612_s1 }
 0x16c   :  { %1843 = vmatprep.subr.bf16.mxu0 %v2572_v0 }
 0x16d   :  { %p2619_p3 = por %p2618_p2, %p2617_p1 }
 0x16f   :  { %1844 = vmatpush1.bf16.msra.mxu0 %v2570_v1  ;;  %p2620_p4 = pnand %p2619_p3, %p2613_p0 }
 0x170   :  { %1845 = vmatprep.subr.bf16.mxu0 %v2575_v37 }
 0x173   :  { %1846 = vmatpush1.bf16.msra.mxu0 %v2573_v52 }
 0x174   :  { %1847 = vmatprep.subr.bf16.mxu0 %v2578_v2 }
 0x177   :  { %1848 = vmatpush1.bf16.msra.mxu0 %v2576_v3 }
 0x178   :  { %1849 = vmatprep.subr.bf16.mxu0 %v2581_v4 }
 0x17b   :  { %1850 = vmatpush1.bf16.msra.mxu0 %v2579_v5 }
 0x17c   :  { %1851 = vmatprep.subr.bf16.mxu0 %v2584_v6 }
 0x17f   :  { %1852 = vmatpush1.bf16.msra.mxu0 %v2582_v7 }
 0x180   :  { %1853 = vmatprep.subr.bf16.mxu0 %v2587_v8 }
 0x183   :  { %1854 = vmatpush1.bf16.msra.mxu0 %v2585_v9 }
 0x184   :  { %1855 = vmatprep.subr.bf16.mxu0 %v2590_v10 }
 0x187   :  { %1856 = vmatpush1.bf16.msra.mxu0 %v2588_v11 }
 0x188   :  { %1857 = vmatprep.subr.bf16.mxu0 %v2593_v12 }
 0x18b   :  { %1858 = vmatpush1.bf16.msra.mxu0 %v2591_v13 }
 0x18c   :  { %1859 = vmatprep.subr.bf16.mxu0 %v2596_v14 }
 0x18f   :  { %1860 = vmatpush1.bf16.msra.mxu0 %v2594_v15 }
 0x190   :  { %1861 = vmatprep.subr.bf16.mxu0 %v2599_v16 }
 0x193   :  { %1862 = vmatpush1.bf16.msra.mxu0 %v2597_v17 }
 0x194   :  { %1863 = vmatprep.subr.bf16.mxu0 %v2602_v22 }
 0x197   :  { %1864 = vmatpush1.bf16.msra.mxu0 %v2600_v23 }
 0x198   :  { %1865 = vmatprep.subr.bf16.mxu0 %v2605_v24 }
 0x19b   :  { %1866 = vmatpush1.bf16.msra.mxu0 %v2603_v25 }
 0x19c   :  { %1867 = vmatprep.subr.bf16.mxu0 %v2608_v26 }
 0x19f   :  { %1868 = vmatpush1.bf16.msra.mxu0 %v2606_v27 }
 0x1a0   :  { %1869 = vmatprep.subr.bf16.mxu0 %v2611_v28 }
 0x1a3   :  { %1870 = vmatpush1.bf16.msra.mxu0 %v2609_v30 }
 0x1a6   :  { %1872 = vmatmul.mubr.bf16.vlgmr.msra.gmra.mrb[4].mxu0 %v3123_v54 }
 0x1f9   :  { %v1709_v39 = vpop.f32.mrb[0].mxu0  ;;  %v1791_v41 = vpop.f32.mrb[8].mxu1 }
 0x1fa   :  { %v2262_v42 = vadd.f32 %v1709_v39, %v450_v34  ;;  %v2264_v54 = vadd.f32 %v1791_v41, %v458_v35  ;;  %v1711_v43 = vpop.f32.mrb[1].mxu0  ;;  %v1793_v20 = vpop.f32.mrb[9].mxu1 }
 0x1fb   :  { %v2263_v44 = vadd.f32 %v1711_v43, %v454_v36  ;;  %v2265_v45 = vadd.f32 %v1793_v20, %v462_v38  ;;  %v1713_v46 = vpop.f32.mrb[2].mxu0  ;;  %v1795_v47 = vpop.f32.mrb[10].mxu1 }
 0x1fc   :  { %1960 = vst [vmem:[#allocation2] sm:$0xff] %v2262_v42  ;;  %1962 = vst [vmem:[#allocation2 + $0x10] sm:$0xff] %v2264_v54  ;;  %v1714_v19 = vpop.f32.mrb[3].mxu0  ;;  %v1796_v32 = vpop.f32.mrb[11].mxu1 }
 0x1fd   :  { %1961 = vst [vmem:[#allocation2 + $0x8] sm:$0xff] %v2263_v44  ;;  %1963 = vst [vmem:[#allocation2 + $0x18] sm:$0xff] %v2265_v45 }
 0x21a   :  { %v2234_v21 = vpop.f32.mrb[12].mxu1 }
 0x21b   :  { %v2235_v40 = vpop.f32.mrb[13].mxu1 }
 0x21c   :  { %v2236_v48 = vadd.f32 %v2235_v40, %v2234_v21  ;;  %v2237_v29 = vpop.f32.mrb[14].mxu1 }
 0x21d   :  { %v2238_v49 = vpop.f32.mrb[15].mxu1 }
 0x21e   :  { %v1915_v56 = vadd.f32 %v2236_v48, %v474_v51 }
 0x23a   :  { %v2256_v53 = vpop.f32.mrb[16].mxu1 }
 0x23b   :  { %v2257_v55 = vpop.f32.mrb[17].mxu1 }
 0x23c   :  { %v2258_v57 = vadd.f32 %v2257_v55, %v2256_v53  ;;  %v2259_v58 = vpop.f32.mrb[18].mxu1 }
 0x23d   :  { %v2260_v59 = vpop.f32.mrb[19].mxu1 }
 0x23e   :  { %v1955_v60 = vadd.f32 %v2258_v57, %v1915_v56 }
 0x240   :  { %1967 = vst.msk [vmem:[#allocation2 + $0x30] sm:$0xff] %vm1966_vm2, %v1955_v60 }
 0x279   :  { %v1873_v0 = vpop.f32.mrb[4].mxu0 }
 0x27a   :  { %v2266_v1 = vadd.f32 %v1873_v0, %v466_v63  ;;  %v1875_v37 = vpop.f32.mrb[5].mxu0 }
 0x27b   :  { %v2267_v52 = vadd.f32 %v1875_v37, %v470_v33  ;;  %v1877_v2 = vpop.f32.mrb[6].mxu0 }
 0x27c   :  { %1964 = vst [vmem:[#allocation2 + $0x20] sm:$0xff] %v2266_v1  ;;  %v1878_v3 = vpop.f32.mrb[7].mxu0 }
 0x27d   :  { %1965 = vst [vmem:[#allocation2 + $0x28] sm:$0xff] %v2267_v52 }
 0x27e   :  { %2623 = shalt.err (!%p2620_p4)
}
 0x27f   :  { %s2624_s16 = scalar_lea.hbm %s3448_s5, 896 }
 0x280   :  { %p2625_p5 = scmp.ne.s32.totalorder %s3448_s5, %s2624_s16  ;;  %p2628_p6 = scmp.lt.u32.totalorder %s2624_s16, %s3448_s5 }
 0x282   :  { %p2630_p7 = pnand %p2628_p6, %p2625_p5 }
 0x284   :  { %2633 = shalt.err (!%p2630_p7)
}
 0x285   :  { %1977 = dma.vmem_to_hbm [thread:$0]  %s1975_s4, 896, %s3448_s5, [#allocation3]  }
 0x286   :  { %2634 = dma.done.wait [#allocation3], 896  }
 0x287   :  { %2635 = vsyncadd [#allocation3], 4294966400 }
 0x288   :  { %1981 = vsyncpa [#allocation3], 1 }

</bundles_post_ra>
